<compile_context>
chip_gen: v6e
topology: v6e:2x2x1
jax: 0.10.0
libtpu: 0.0.40
codegen_flags: <defaults>
</compile_context>

<pallas_src>
import functools

import jax
import jax.numpy as jnp
from jax.experimental import pallas as pl
from jax.experimental.pallas import tpu as pltpu


_DEFAULT_VMEM_CAP = 64 << 20  # conservative fallback (v7x per-TC VMEM)


def _cdiv(a, b):
    return -(-a // b)


def _vmem_capacity_bytes():
    try:
        cap = int(pltpu.get_tpu_info().vmem_capacity_bytes)
        if cap > 0:
            return cap
    except Exception:
        pass
    return _DEFAULT_VMEM_CAP


def _vmem_limit_bytes():
    # Raise the scoped-VMEM limit above the defaults (16 MiB v5e / 32 MiB
    # v6e+v7x) but stay well under physical capacity per generation:
    # v5e/v6e (128 MiB parts) -> 96 MiB, v7x (64 MiB part) -> 48 MiB.
    return int(min(_vmem_capacity_bytes() * 3 // 4, 96 << 20))


def _choose_tiling(rows, cols, in_itemsize):
    """Pick (block_rows, num_blocks) for a (rows, cols) stage."""
    # Per-row-of-block VMEM footprint estimate:
    #   2 inputs x 2 pipeline buffers x cols x itemsize   (auto-pipelined DMA)
    # + ~8 f32 cols-wide live intermediates in the body
    #   (s/t f32 casts, d, exp_s, exp_t, exp_t*d, slack for layout copies).
    bytes_per_row = cols * (4 * in_itemsize + 8 * 4)
    limit = _vmem_limit_bytes()
    # Less headroom on the 64 MiB generation (v7x); slack on 128 MiB parts.
    factor = 0.6 if _vmem_capacity_bytes() >= (96 << 20) else 0.5
    work_budget = int(limit * factor)
    max_block_rows = max(8, (work_budget // bytes_per_row) // 8 * 8)
    max_block_rows = min(max_block_rows, 16384)  # VMEM budget is the real cap

    rows_p = _cdiv(rows, 8) * 8
    num_blocks = _cdiv(rows_p, max_block_rows)            # balanced block count
    block_rows = _cdiv(_cdiv(rows_p, num_blocks), 8) * 8  # multiple of 8
    num_blocks = _cdiv(rows, block_rows)                  # grid over real rows
    return block_rows, num_blocks


def _cwd_kernel(s_ref, t_ref, out_ref, *, inv_tau, rows_total, block_rows):
    """Per-block channel-wise KL partial sum.

    s_ref, t_ref : (block_rows, HW) student / teacher logits block
    out_ref      : (1, 8, 128) partial sum for this block (broadcast-filled)
    """
    i = pl.program_id(0)

    s = s_ref[...].astype(jnp.float32)
    t = t_ref[...].astype(jnp.float32)
    if inv_tau != 1.0:  # skip two full-block multiplies when tau == 1
        s = s * inv_tau
        t = t * inv_tau

    # sum_j p_t (log p_t - log p_s)
    #   = (1/sum_t) * sum_j exp(t - max_t) * (t - s)
    #     + (max_s - max_t) + log(sum_s) - log(sum_t)
    d = t - s
    max_s = jnp.max(s, axis=-1, keepdims=True)
    max_t = jnp.max(t, axis=-1, keepdims=True)

    exp_s = jnp.exp(s - max_s)
    sum_s = jnp.sum(exp_s, axis=-1, keepdims=True)

    exp_t = jnp.exp(t - max_t)
    sum_t = jnp.sum(exp_t, axis=-1, keepdims=True)
    a = jnp.sum(exp_t * d, axis=-1, keepdims=True)

    row_kl = a / sum_t + (max_s - max_t) + jnp.log(sum_s) - jnp.log(sum_t)

    # Mask the ragged tail rows of the last block: the input block overhangs
    # the array edge there and its contents are unspecified.
    if rows_total % block_rows != 0:
        rows_valid = rows_total - i * block_rows
        row_id = jax.lax.broadcasted_iota(jnp.int32, (block_rows, 1), 0)
        row_kl = jnp.where(row_id < rows_valid, row_kl, 0.0)

    block_sum = jnp.sum(row_kl, axis=0, keepdims=True)   # (1, 1)
    out_ref[...] = jnp.broadcast_to(block_sum, out_ref.shape)


def _cwd_loss_single_stage(s, t, tau=1.0):
    """Loss for one pyramid stage. s, t: (N, C, H, W) with identical shapes."""
    assert s.shape == t.shape
    assert s.dtype == t.dtype  # _choose_tiling sizes VMEM from this itemsize
    N, C, H, W = s.shape
    rows, cols = N * C, H * W
    # Keep native dtype (e.g. bf16 upstream halves HBM traffic); the kernel
    # casts to f32 internally so the math is always f32.
    s2 = s.reshape(rows, cols)
    t2 = t.reshape(rows, cols)

    block_rows, num_blocks = _choose_tiling(
        rows, cols, jnp.dtype(s2.dtype).itemsize)

    scale = (tau * tau) / (C * N)
    kernel = functools.partial(
        _cwd_kernel, inv_tau=float(1.0 / tau),
        rows_total=rows, block_rows=block_rows)

    # Each grid step writes its own disjoint (1, 8, 128) partial-sum tile, so
    # the grid axis is "parallel": on v7x both TensorCores work on disjoint row
    # blocks; on v5e/v6e (single TC) this is neutral.
    partials = pl.pallas_call(
        kernel,
        out_shape=jax.ShapeDtypeStruct((num_blocks, 8, 128), jnp.float32),
        grid_spec=pltpu.PrefetchScalarGridSpec(
            num_scalar_prefetch=0,
            grid=(num_blocks,),
            in_specs=[
                pl.BlockSpec((block_rows, cols), lambda i: (i, 0)),
                pl.BlockSpec((block_rows, cols), lambda i: (i, 0)),
            ],
            out_specs=pl.BlockSpec((1, 8, 128), lambda i: (i, 0, 0)),
        ),
        compiler_params=pltpu.CompilerParams(
            dimension_semantics=("parallel",),
            vmem_limit_bytes=_vmem_limit_bytes(),
        ),
    )(s2, t2)

    # One representative element per block tile; tiny final reduce + scale in JAX.
    return jnp.sum(partials[:, 0, 0]) * scale


def cwd_loss(y_s, y_t, tau=1.0):
    """CWDLoss.forward: y_s, y_t are lists of (N, C, H, W) feature maps."""
    assert len(y_s) == len(y_t)
    total = jnp.float32(0.0)
    for s, t in zip(y_s, y_t):
        total = total + _cwd_loss_single_stage(s, t, tau=tau)
    return total


def _reference_cwd_loss(y_s, y_t, tau=1.0):
    """Pure-JAX reference (mirrors the PyTorch module) for verification."""
    total = 0.0
    for s, t in zip(y_s, y_t):
        N, C, H, W = s.shape
        s2 = s.reshape(-1, H * W).astype(jnp.float32) / tau
        t2 = t.reshape(-1, H * W).astype(jnp.float32) / tau
        p_t = jax.nn.softmax(t2, axis=1)
        cost = jnp.sum(
            p_t * jax.nn.log_softmax(t2, axis=1)
            - p_t * jax.nn.log_softmax(s2, axis=1)
        ) * tau ** 2
        total = total + cost / (C * N)
    return total


if __name__ == "__main__":
    key = jax.random.PRNGKey(0)
    ks = jax.random.split(key, 6)

    # Three pyramid stages, small shapes (N, C, H, W).
    # Stage 3 has N*C = 3 (not a multiple of 8) to exercise the in-kernel
    # ragged-tail row mask.
    shapes = [(2, 4, 16, 16), (2, 8, 8, 8), (1, 3, 16, 16)]
    y_s = [jax.random.normal(ks[i], sh, dtype=jnp.float32)
           for i, sh in enumerate(shapes)]
    y_t = [jax.random.normal(ks[3 + i], sh, dtype=jnp.float32)
           for i, sh in enumerate(shapes)]

    tau = 1.0
    loss = jax.block_until_ready(cwd_loss(y_s, y_t, tau=tau))
    ref = jax.block_until_ready(_reference_cwd_loss(y_s, y_t, tau=tau))
    assert jnp.allclose(loss, ref, rtol=1e-4, atol=1e-5), (loss, ref)

    print("KERNEL_OK")
</pallas_src>

<mosaic_0001>
module attributes {stable_mosaic.version = 11 : i64} {
  func.func @_cwd_kernel(%arg0: i32, %arg1: memref<8x256xf32, #tpu.memory_space<vmem>>, %arg2: memref<8x256xf32, #tpu.memory_space<vmem>>, %arg3: memref<1x8x128xf32, #tpu.memory_space<vmem>>) attributes {dimension_semantics = [#tpu.dimension_semantics<parallel>], iteration_bounds = array<i64: 1>, scalar_prefetch = 0 : i64, scratch_operands = 0 : i64, tpu.core_type = #tpu.core_type<tc>, window_params = [{transform_indices = @transform_0, window_bounds = array<i64: 8, 256>}, {transform_indices = @transform_1, window_bounds = array<i64: 8, 256>}, {transform_indices = @transform_2, window_bounds = array<i64: 1, 8, 128>}]} {
    %c0 = arith.constant 0 : index
    %c0_0 = arith.constant 0 : index
    %0 = vector.load %arg1[%c0, %c0_0] : memref<8x256xf32, #tpu.memory_space<vmem>>, vector<8x256xf32>
    %c0_1 = arith.constant 0 : index
    %c0_2 = arith.constant 0 : index
    %1 = vector.load %arg2[%c0_1, %c0_2] : memref<8x256xf32, #tpu.memory_space<vmem>>, vector<8x256xf32>
    %2 = arith.subf %1, %0 : vector<8x256xf32>
    %cst = arith.constant dense<0xFF800000> : vector<8xf32>
    %3 = vector.multi_reduction <maximumf>, %0, %cst [1] : vector<8x256xf32> to vector<8xf32>
    %4 = vector.shape_cast %3 : vector<8xf32> to vector<8x1xf32>
    %cst_3 = arith.constant dense<0xFF800000> : vector<8xf32>
    %5 = vector.multi_reduction <maximumf>, %1, %cst_3 [1] : vector<8x256xf32> to vector<8xf32>
    %6 = vector.shape_cast %5 : vector<8xf32> to vector<8x1xf32>
    %7 = vector.broadcast %4 : vector<8x1xf32> to vector<8x256xf32>
    %8 = arith.subf %0, %7 : vector<8x256xf32>
    %9 = math.exp %8 : vector<8x256xf32>
    %cst_4 = arith.constant dense<0.000000e+00> : vector<8xf32>
    %10 = vector.multi_reduction <add>, %9, %cst_4 [1] : vector<8x256xf32> to vector<8xf32>
    %11 = vector.shape_cast %10 : vector<8xf32> to vector<8x1xf32>
    %12 = vector.broadcast %6 : vector<8x1xf32> to vector<8x256xf32>
    %13 = arith.subf %1, %12 : vector<8x256xf32>
    %14 = math.exp %13 : vector<8x256xf32>
    %cst_5 = arith.constant dense<0.000000e+00> : vector<8xf32>
    %15 = vector.multi_reduction <add>, %14, %cst_5 [1] : vector<8x256xf32> to vector<8xf32>
    %16 = vector.shape_cast %15 : vector<8xf32> to vector<8x1xf32>
    %17 = arith.mulf %14, %2 : vector<8x256xf32>
    %cst_6 = arith.constant dense<0.000000e+00> : vector<8xf32>
    %18 = vector.multi_reduction <add>, %17, %cst_6 [1] : vector<8x256xf32> to vector<8xf32>
    %19 = vector.shape_cast %18 : vector<8xf32> to vector<8x1xf32>
    %20 = arith.divf %19, %16 : vector<8x1xf32>
    %21 = arith.subf %4, %6 : vector<8x1xf32>
    %22 = arith.addf %20, %21 : vector<8x1xf32>
    %23 = math.log %11 : vector<8x1xf32>
    %24 = arith.addf %22, %23 : vector<8x1xf32>
    %25 = math.log %16 : vector<8x1xf32>
    %26 = arith.subf %24, %25 : vector<8x1xf32>
    %cst_7 = arith.constant dense<0.000000e+00> : vector<1xf32>
    %27 = vector.multi_reduction <add>, %26, %cst_7 [0] : vector<8x1xf32> to vector<1xf32>
    %28 = vector.shape_cast %27 : vector<1xf32> to vector<1x1xf32>
    %29 = vector.shape_cast %28 : vector<1x1xf32> to vector<1x1x1xf32>
    %30 = vector.broadcast %29 : vector<1x1x1xf32> to vector<1x8x128xf32>
    %c0_8 = arith.constant 0 : index
    %c0_9 = arith.constant 0 : index
    %c0_10 = arith.constant 0 : index
    %31 = vector.load %arg3[%c0_8, %c0_9, %c0_10] : memref<1x8x128xf32, #tpu.memory_space<vmem>>, vector<1x8x128xf32>
    tpu.vector_store %arg3[%c0_8, %c0_9, %c0_10], %30 {strides = array<i32>} : memref<1x8x128xf32, #tpu.memory_space<vmem>>, vector<1x8x128xf32>,
    return
  }
  func.func @transform_0(%arg0: i32) -> (i32, i32) {
    %c0_i32 = arith.constant 0 : i32
    %c0_i32_0 = arith.constant 0 : i32
    return %arg0, %c0_i32 : i32, i32
  }
  func.func @transform_1(%arg0: i32) -> (i32, i32) {
    %c0_i32 = arith.constant 0 : i32
    %c0_i32_0 = arith.constant 0 : i32
    return %arg0, %c0_i32 : i32, i32
  }
  func.func @transform_2(%arg0: i32) -> (i32, i32, i32) {
    %c0_i32 = arith.constant 0 : i32
    %c0_i32_0 = arith.constant 0 : i32
    %c0_i32_1 = arith.constant 0 : i32
    return %arg0, %c0_i32, %c0_i32_0 : i32, i32, i32
  }
}

</mosaic_0001>

<bundles_post_ra>
// kernel: tpu_custom_call.1
= control target key start
LH: loop header
LB: loop body
LE: loop exit
PB: predicated region body
PF: predicated region fallthrough
CT: control target
= control target key end

     0   :  { %7 = vsyncpa [#allocation3], 0  ;;  %s214_s0 = inlined_call_operand.hbm [shape: f32[8,256], index: 0, kind: input, shape index: {}]   ;;  %s215_s1 = inlined_call_operand.hbm [shape: f32[8,256], index: 1, kind: input, shape index: {}]   ;;  %s216_s2 = inlined_call_operand.hbm [shape: f32[1,8,128], index: 2, kind: output, shape index: {}]  }
   0x1   :  { %8 = vsyncpa [#allocation6], 0 }
   0x2   :  { %9 = vsyncpa [#allocation4], 0  ;;  %s187_s9 = smov [#allocation2]   ;;  %s188_s11 = smov [#allocation5]  }
   0x3   :  { %s16_s10 = sshll.u32 %s187_s9, 4  ;;  %s26_s12 = sshll.u32 %s188_s11, 4  ;;  %s17_s10 = int_to_ptr.vmem [resolvable:$true] %s16_s10  ;;  %s27_s12 = int_to_ptr.vmem [resolvable:$true] %s26_s12 }
   0x4   :  { %s129_s13 = scalar_lea.vmem %s17_s10, 256  ;;  %p134_p1 = scmp.lt.s32.totalorder %s17_s10, %s17_s10 }
   0x5   :  { %p130_p0 = scmp.ne.s32.totalorder %s17_s10, %s129_s13  ;;  %p135_p2 = scmp.lt.s32.totalorder %s129_s13, %s129_s13 }
   0x7   :  { %p136_p3 = por %p135_p2, %p134_p1 }
   0x9   :  { %p137_p4 = pnand %p136_p3, %p130_p0 }
   0xb   :  { %140 = shalt.err (!%p137_p4)
}
   0xc   :  { %19 = dma.hbm_to_vmem [thread:$0]  %s214_s0, 256, %s17_s10, [#allocation3]  }
   0xd   :  { %s149_s16 = scalar_lea.vmem %s27_s12, 256  ;;  %p154_p6 = scmp.lt.s32.totalorder %s27_s12, %s27_s12 }
   0xe   :  { %p150_p5 = scmp.ne.s32.totalorder %s27_s12, %s149_s16  ;;  %p155_p7 = scmp.lt.s32.totalorder %s149_s16, %s149_s16 }
  0x10   :  { %p156_p8 = por %p155_p7, %p154_p6 }
  0x12   :  { %p157_p9 = pnand %p156_p8, %p150_p5 }
  0x14   :  { %160 = shalt.err (!%p157_p9)
}
  0x15   :  { %29 = dma.hbm_to_vmem [thread:$0]  %s215_s1, 256, %s27_s12, [#allocation6]  }
  0x16   :  { %181 = dma.done.wait [#allocation3], 256  }
  0x17   :  { %182 = vsyncadd [#allocation3], 4294967040 }
  0x18   :  { %183 = dma.done.wait [#allocation6], 256  }
  0x19   :  { %184 = vsyncadd [#allocation6], 4294967040  ;;  %v38_v0 = vld [vmem:[#allocation5] sm:$0xff]  ;;  %v39_v1 = vld [vmem:[#allocation5 + $0x8] sm:$0xff]  ;;  %s189_s0 = smov [#allocation7]  }
  0x1a   :  { %v36_v2 = vld [vmem:[#allocation2] sm:$0xff]  ;;  %v45_v3 = vmax.f32 %v38_v0, %v39_v1  ;;  %v37_v4 = vld [vmem:[#allocation2 + $0x8] sm:$0xff]  ;;  %s94_s1 = sshll.u32 %s189_s0, 4  ;;  %s95_s1 = int_to_ptr.vmem [resolvable:$true] %s94_s1 }
  0x1b   :  { %v42_v5 = vmax.f32 %v36_v2, %v37_v4  ;;  %v40_v16 = vsub.f32 %v38_v0, %v36_v2  ;;  %v41_v17 = vsub.f32 %v39_v1, %v37_v4  ;;  %s161_s19 = scalar_lea.vmem %s95_s1, 128  ;;  %p166_p11 = scmp.lt.s32.totalorder %s95_s1, %s95_s1 }
  0x1c   :  { %46 = vmax.xlane.f32.xlu0 %v45_v3  ;;  %p162_p10 = scmp.ne.s32.totalorder %s95_s1, %s161_s19  ;;  %p167_p12 = scmp.lt.s32.totalorder %s161_s19, %s161_s19 }
  0x1e   :  { %p168_p13 = por %p167_p12, %p166_p11 }
  0x20   :  { %43 = vmax.xlane.f32.xlu0 %v42_v5  ;;  %p169_p0 = pnand %p168_p13, %p162_p10 }
  0xa5   :  { %v47_v6 = vpop.xlane.xlu0 %46 }
  0xa6   :  { %v57_v7 = vsub.f32 %v38_v0, %v47_v6  ;;  %v58_v8 = vsub.f32 %v39_v1, %v47_v6 }
  0xa8   :  { %v59_v9 = vmul.f32 1.442695, %v57_v7  ;;  %v61_v10 = vmul.f32 1.442695, %v58_v8 }
  0xa9   :  { %v44_v11 = vpop.xlane.xlu0 %43 }
  0xaa   :  { %107 = vpow2.f32 %v59_v9  ;;  %v48_v12 = vsub.f32 %v36_v2, %v44_v11  ;;  %v49_v13 = vsub.f32 %v37_v4, %v44_v11  ;;  %v73_v33 = vsub.f32 %v44_v11, %v47_v6 }
  0xab   :  { %109 = vpow2.f32 %v61_v10 }
  0xac   :  { %v50_v14 = vmul.f32 1.442695, %v48_v12  ;;  %v52_v15 = vmul.f32 1.442695, %v49_v13 }
  0xae   :  { %111 = vpow2.f32 %v50_v14 }
  0xaf   :  { %113 = vpow2.f32 %v52_v15 }
  0xb7   :  { %v108_v18 = vpop.eup %107 }
  0xb8   :  { %v110_v19 = vpop.eup %109  ;;  %v66_v20 = vmul.f32 %v108_v18, %v40_v16 }
  0xb9   :  { %v63_v21 = vadd.f32 %v110_v19, %v108_v18  ;;  %v67_v22 = vmul.f32 %v110_v19, %v41_v17 }
  0xbb   :  { %v112_v23 = vpop.eup %111  ;;  %64 = vadd.xlane.f32.xlu1 %v63_v21  ;;  %v68_v24 = vadd.f32 %v67_v22, %v66_v20 }
  0xbc   :  { %v114_v25 = vpop.eup %113 }
  0xbd   :  { %69 = vadd.xlane.f32.xlu0 %v68_v24  ;;  %v54_v26 = vadd.f32 %v114_v25, %v112_v23 }
  0xbf   :  { %55 = vadd.xlane.f32.xlu1 %v54_v26 }
 0x144   :  { %v65_v27 = vpop.xlane.xlu1 %64 }
 0x145   :  { %115 = vrcp.f32 %v65_v27 }
 0x146   :  { %117 = vlog2.f32 %v65_v27  ;;  %v70_v30 = vpop.xlane.xlu0 %69 }
 0x148   :  { %v56_v28 = vpop.xlane.xlu1 %55 }
 0x149   :  { %119 = vlog2.f32 %v56_v28 }
 0x152   :  { %v116_v29 = vpop.eup %115 }
 0x153   :  { %v72_v31 = vmul.f32 %v116_v29, %v70_v30  ;;  %v118_v32 = vpop.eup %117 }
 0x154   :  { %v79_v37 = vmul.f32 0.6931472, %v118_v32 }
 0x155   :  { %v74_v35 = vadd.f32 %v73_v33, %v72_v31 }
 0x156   :  { %v120_v34 = vpop.eup %119 }
 0x157   :  { %v76_v36 = vmul.f32 0.6931472, %v120_v34 }
 0x159   :  { %v77_v38 = vadd.f32 %v76_v36, %v74_v35 }
 0x15b   :  { %v80_v39 = vsub.f32 %v77_v38, %v79_v37 }
 0x15d   :  { %v81_v40 = vrot.slane %v80_v39, 4 }
 0x15f   :  { %v82_v41 = vadd.f32 %v81_v40, %v80_v39 }
 0x161   :  { %v83_v42 = vrot.slane %v82_v41, 2 }
 0x163   :  { %v84_v43 = vadd.f32 %v83_v42, %v82_v41 }
 0x165   :  { %v85_v44 = vrot.slane %v84_v43, 1 }
 0x167   :  { %v86_v45 = vadd.f32 %v85_v44, %v84_v43 }
 0x169   :  { %87 = vst [vmem:[#allocation7] sm:$0xff] %v86_v45 }
 0x16a   :  { %172 = shalt.err (!%p169_p0)
}
 0x16b   :  { %97 = dma.vmem_to_hbm [thread:$0]  %s95_s1, 128, %s216_s2, [#allocation4]  }
 0x16c   :  { %185 = dma.done.wait [#allocation4], 128  }
 0x16d   :  { %186 = vsyncadd [#allocation4], 4294967168 }
 0x16e   :  { %101 = vsyncpa [#allocation3], 1 }
 0x16f   :  { %102 = vsyncpa [#allocation6], 1 }
 0x170   :  { %103 = vsyncpa [#allocation4], 1 }

</bundles_post_ra>
